<compile_context>
chip_gen: v5e
topology: v5e:2x2
jax: 0.10.0
libtpu: 0.0.40
codegen_flags: <defaults>
</compile_context>

<pallas_src>
import functools

import jax
import jax.numpy as jnp
from jax.experimental import pallas as pl
from jax.experimental.pallas import tpu as pltpu


def block_kernel(x_ref, wqkv_ref, wproj_ref, bproj_ref,
                 ln1_g_ref, ln1_b_ref, ln2_g_ref, ln2_b_ref,
                 w1_ref, b1_ref, w2_ref, b2_ref,
                 out_ref, attn_sc,
                 *, num_heads, head_size, mm_dtype):
    x = x_ref[...].astype(jnp.float32)                      # (T, E): one sequence
    T, E = x.shape
    eps = 1e-5
    neg = -1e30

    def layernorm(v, g, b):
        mu = jnp.mean(v, axis=-1, keepdims=True)
        var = jnp.mean((v - mu) ** 2, axis=-1, keepdims=True)
        return (v - mu) * jax.lax.rsqrt(var + eps) * g + b

    # ---- multi-head causal attention on LN1(x) ----
    h1 = layernorm(x, ln1_g_ref[...], ln1_b_ref[...])                    # (T, E)

    # Fused QKV projection (1/sqrt(head_size) already folded into the Wq slice
    # wrapper-side).  f32 accumulation regardless of operand dtype.
    qkv = jnp.dot(h1.astype(mm_dtype), wqkv_ref[...],
                  preferred_element_type=jnp.float32)                    # (T, 3E)
    q = qkv[:, 0:E]
    k = qkv[:, E:2 * E]
    v = qkv[:, 2 * E:3 * E]

    # Plain causal mask on (T, T): no cross-sequence masking, no integer div.
    row = jax.lax.broadcasted_iota(jnp.int32, (T, T), 0)
    col = jax.lax.broadcasted_iota(jnp.int32, (T, T), 1)
    mask = col <= row

    # Per-head attention.  Each head's context vectors land in column block
    # [lo:lo+hs] of the (T, E) VMEM scratch so the output projection can be a
    # single full-K matmul afterwards.  (Static unroll is fine for a small
    # head count; for >= 8 heads use lax.fori_loop + pl.ds to bound live
    # ranges.  For long T, replace the dense (T, T) scores with a flash-style
    # kv-block loop that skips blocks above the diagonal.)
    for h in range(num_heads):
        lo = h * head_size
        qh = q[:, lo:lo + head_size].astype(mm_dtype)
        kh = k[:, lo:lo + head_size].astype(mm_dtype)
        vh = v[:, lo:lo + head_size].astype(mm_dtype)
        # Contract the shared last dim -> no transpose / relayout of kh.
        s = jax.lax.dot_general(qh, kh, (((1,), (1,)), ((), ())),
                                preferred_element_type=jnp.float32)      # (T, T)
        s = jnp.where(mask, s, neg)
        s = s - jnp.max(s, axis=-1, keepdims=True)
        p = jnp.exp(s)
        inv = pl.reciprocal(jnp.sum(p, axis=-1, keepdims=True),
                            approx=True)                                 # EUP vrcp
        hv = jnp.dot(p.astype(mm_dtype), vh,
                     preferred_element_type=jnp.float32) * inv           # (T, hs)
        attn_sc[:, lo:lo + head_size] = hv

    # Single full-K output projection (near-full MXU utilization vs. num_heads
    # K=head_size matmuls).
    attn = jnp.dot(attn_sc[...].astype(mm_dtype), wproj_ref[...],
                   preferred_element_type=jnp.float32) + bproj_ref[...]  # (T, E)

    x1 = x + attn                                                        # residual 1

    # ---- feed-forward on LN2(x1) ----
    # NOTE: at large E, tile W1 columns / W2 rows over the 4E hidden dim
    # (emit_pipeline or an extra 'arbitrary' grid axis) to bound weight VMEM.
    h2 = layernorm(x1, ln2_g_ref[...], ln2_b_ref[...])
    ff = jnp.dot(h2.astype(mm_dtype), w1_ref[...],
                 preferred_element_type=jnp.float32) + b1_ref[...]
    ff = jnp.maximum(ff, 0.0)
    ff = jnp.dot(ff.astype(mm_dtype), w2_ref[...],
                 preferred_element_type=jnp.float32) + b2_ref[...]

    out_ref[...] = (x1 + ff).astype(out_ref.dtype)                       # residual 2


def prepare_block_weights(params, *, head_size, matmul_dtype=jnp.float32):
    """One-time weight prep: fuse Q/K/V, fold the 1/sqrt(hs) scale, cast MXU
    operands.  Cache the result across calls in a decode/step loop."""
    (wq, wk, wv, wp, bp, g1, be1, g2, be2, w1, b1, w2, b2) = params
    scale = 1.0 / (head_size ** 0.5)
    wqkv = jnp.concatenate([wq * scale, wk, wv], axis=1)                 # (E, 3E)
    mm = matmul_dtype
    return (wqkv.astype(mm), wp.astype(mm), bp, g1, be1, g2, be2,
            w1.astype(mm), b1, w2.astype(mm), b2)


def _vmem_limit_bytes(T, E, x_itemsize, mm_itemsize):
    """Resident-set estimate (weights double-buffered + io blocks + scratch +
    f32 intermediates), with generous headroom, clamped to sane bounds."""
    H4 = 4 * E
    weights = (3 * E * E + E * E + E * H4 + H4 * E) * mm_itemsize
    biases = (6 * E + H4) * 4
    io = 2 * T * E * x_itemsize
    scratch = T * E * 4
    temps = (3 * T * E + T * H4 + T * T + 4 * T * E) * 4
    total = 2 * (weights + biases + io) + scratch + temps
    return int(min(max(2 * total + (4 << 20), 32 << 20), 100 << 20))


def transformer_block_prepared(x, prepared, *, num_heads, head_size,
                               matmul_dtype=jnp.float32):
    """Forward pass of `Block` on x of shape (B, T, E) with pre-fused weights."""
    B, T, E = x.shape
    H4 = 4 * E
    assert num_heads * head_size == E, "concat of heads must match embed_size"
    # (8,128) rule for the (T, E) block: T must be a multiple of 8 (pad if not);
    # E is always the full last dim.  E % 128 == 0 is recommended for
    # lane-dense stores / full MXU utilization at realistic sizes.
    assert T % 8 == 0, "pad T to a multiple of 8"

    (wqkv, wp, bp, g1, be1, g2, be2, w1, b1, w2, b2) = prepared
    mm = matmul_dtype

    # Present a 2-D (B*T, E) view; one grid step per sequence -> (T, T) scores,
    # pipelined x/out DMA, and >= 2 parallel steps for v7x megacore when B > 1.
    x2d = x.reshape(B * T, E)

    kernel = functools.partial(block_kernel, num_heads=num_heads,
                               head_size=head_size, mm_dtype=mm)

    def const(shape):
        # Constant index_map -> block is fetched once and kept resident.
        # At large E add pipeline_mode=pl.Buffered(1) to single-buffer these
        # weights (halves their VMEM footprint on v7x's 64 MiB).
        return pl.BlockSpec(shape, lambda b: (0, 0))

    in_specs = [
        pl.BlockSpec((T, E), lambda b: (b, 0)),          # x: one sequence/step
        const((E, 3 * E)),                               # Wqkv (fused, scaled)
        const((E, E)), const((1, E)),                    # Wproj, bproj
        const((1, E)), const((1, E)),                    # ln1 gamma, beta
        const((1, E)), const((1, E)),                    # ln2 gamma, beta
        const((E, H4)), const((1, H4)),                  # W1, b1
        const((H4, E)), const((1, E)),                   # W2, b2
    ]

    vmem_limit = _vmem_limit_bytes(T, E,
                                   jnp.dtype(x.dtype).itemsize,
                                   jnp.dtype(mm).itemsize)

    out2d = pl.pallas_call(
        kernel,
        out_shape=jax.ShapeDtypeStruct((B * T, E), x.dtype),
        grid_spec=pltpu.PrefetchScalarGridSpec(
            num_scalar_prefetch=0,
            grid=(B,),
            in_specs=in_specs,
            out_specs=pl.BlockSpec((T, E), lambda b: (b, 0)),
            scratch_shapes=[pltpu.VMEM((T, E), jnp.float32)],   # per-head ctx slab
        ),
        compiler_params=pltpu.CompilerParams(
            dimension_semantics=("parallel",),
            vmem_limit_bytes=vmem_limit),
    )(x2d, wqkv, wp, bp, g1, be1, g2, be2, w1, b1, w2, b2)
    return out2d.reshape(B, T, E)


def transformer_block(x, params, *, num_heads, head_size,
                      matmul_dtype=jnp.float32):
    prepared = prepare_block_weights(params, head_size=head_size,
                                     matmul_dtype=matmul_dtype)
    return transformer_block_prepared(x, prepared, num_heads=num_heads,
                                      head_size=head_size,
                                      matmul_dtype=matmul_dtype)


def reference_block(x, params, *, num_heads, head_size):
    (wq, wk, wv, wp, bp, g1, be1, g2, be2, w1, b1, w2, b2) = params
    eps = 1e-5

    def ln(v, g, b):
        mu = v.mean(-1, keepdims=True)
        var = ((v - mu) ** 2).mean(-1, keepdims=True)
        return (v - mu) / jnp.sqrt(var + eps) * g + b

    B, T, E = x.shape
    h = ln(x, g1, be1)
    q = h @ wq
    k = h @ wk
    v = h @ wv
    mask = jnp.tril(jnp.ones((T, T), bool))
    outs = []
    for hd in range(num_heads):
        lo = hd * head_size
        qh, kh, vh = (a[..., lo:lo + head_size] for a in (q, k, v))
        s = jnp.einsum('btd,bsd->bts', qh, kh) / (head_size ** 0.5)
        s = jnp.where(mask, s, -jnp.inf)
        p = jax.nn.softmax(s, axis=-1)
        outs.append(jnp.einsum('bts,bsd->btd', p, vh))
    attn = jnp.concatenate(outs, axis=-1) @ wp + bp
    x1 = x + attn
    h2 = ln(x1, g2, be2)
    ff = jax.nn.relu(h2 @ w1 + b1) @ w2 + b2
    return x1 + ff


def init_params(key, embed_size, num_heads, head_size):
    E, H4 = embed_size, 4 * embed_size
    ks = jax.random.split(key, 8)
    scale = 0.02
    wq = scale * jax.random.normal(ks[0], (E, num_heads * head_size), jnp.float32)
    wk = scale * jax.random.normal(ks[1], (E, num_heads * head_size), jnp.float32)
    wv = scale * jax.random.normal(ks[2], (E, num_heads * head_size), jnp.float32)
    wp = scale * jax.random.normal(ks[3], (E, E), jnp.float32)
    bp = scale * jax.random.normal(ks[4], (1, E), jnp.float32)
    g1 = jnp.ones((1, E), jnp.float32)
    be1 = jnp.zeros((1, E), jnp.float32)
    g2 = jnp.ones((1, E), jnp.float32)
    be2 = jnp.zeros((1, E), jnp.float32)
    w1 = scale * jax.random.normal(ks[5], (E, H4), jnp.float32)
    b1 = scale * jax.random.normal(ks[6], (1, H4), jnp.float32)
    w2 = scale * jax.random.normal(ks[7], (H4, E), jnp.float32)
    b2 = jnp.zeros((1, E), jnp.float32)
    return (wq, wk, wv, wp, bp, g1, be1, g2, be2, w1, b1, w2, b2)


if __name__ == "__main__":
    B, T = 2, 8                          # block_size == T == 8
    num_heads, head_size = 2, 16
    embed_size = num_heads * head_size   # 32 (concat of heads must match proj)

    key = jax.random.PRNGKey(0)
    kx, kp = jax.random.split(key)
    x = jax.random.normal(kx, (B, T, embed_size), jnp.float32)
    params = init_params(kp, embed_size, num_heads, head_size)

    ref = reference_block(x, params, num_heads=num_heads, head_size=head_size)

    # f32-operand run (weights prepared once, reusable across calls).
    # Tolerance 1e-3 because the softmax denominator uses the approximate EUP
    # reciprocal (pl.reciprocal(..., approx=True)).
    prep_f32 = prepare_block_weights(params, head_size=head_size,
                                     matmul_dtype=jnp.float32)
    out = transformer_block_prepared(x, prep_f32, num_heads=num_heads,
                                     head_size=head_size,
                                     matmul_dtype=jnp.float32)
    out = jax.block_until_ready(out)
    assert out.shape == (B, T, embed_size)
    assert jnp.allclose(out, ref, rtol=1e-3, atol=1e-3), "f32 mismatch vs reference"

    # bf16 MXU-operand run (recommended fast path on v5e/v6e/v7x; f32
    # accumulation + f32 LN/softmax throughout).
    prep_bf16 = prepare_block_weights(params, head_size=head_size,
                                      matmul_dtype=jnp.bfloat16)
    out_bf16 = transformer_block_prepared(x, prep_bf16, num_heads=num_heads,
                                          head_size=head_size,
                                          matmul_dtype=jnp.bfloat16)
    out_bf16 = jax.block_until_ready(out_bf16)
    assert jnp.allclose(out_bf16, ref, rtol=2e-2, atol=2e-2), "bf16 mismatch vs reference"

    print("KERNEL_OK")
</pallas_src>

<mosaic_0001>
module attributes {stable_mosaic.version = 11 : i64} {
  func.func @block_kernel(%arg0: i32, %arg1: memref<8x32xf32, #tpu.memory_space<vmem>>, %arg2: memref<32x96xf32, #tpu.memory_space<vmem>>, %arg3: memref<32x32xf32, #tpu.memory_space<vmem>>, %arg4: memref<1x32xf32, #tpu.memory_space<vmem>>, %arg5: memref<1x32xf32, #tpu.memory_space<vmem>>, %arg6: memref<1x32xf32, #tpu.memory_space<vmem>>, %arg7: memref<1x32xf32, #tpu.memory_space<vmem>>, %arg8: memref<1x32xf32, #tpu.memory_space<vmem>>, %arg9: memref<32x128xf32, #tpu.memory_space<vmem>>, %arg10: memref<1x128xf32, #tpu.memory_space<vmem>>, %arg11: memref<128x32xf32, #tpu.memory_space<vmem>>, %arg12: memref<1x32xf32, #tpu.memory_space<vmem>>, %arg13: memref<8x32xf32, #tpu.memory_space<vmem>>, %arg14: memref<8x32xf32, #tpu.memory_space<vmem>>) attributes {dimension_semantics = [#tpu.dimension_semantics<parallel>], iteration_bounds = array<i64: 2>, scalar_prefetch = 0 : i64, scratch_operands = 1 : i64, tpu.core_type = #tpu.core_type<tc>, window_params = [{transform_indices = @transform_0, window_bounds = array<i64: 8, 32>}, {pipeline_mode = #tpu.pipeline_mode<synchronous>, transform_indices = @transform_1, window_bounds = array<i64: 32, 96>}, {pipeline_mode = #tpu.pipeline_mode<synchronous>, transform_indices = @transform_2, window_bounds = array<i64: 32, 32>}, {pipeline_mode = #tpu.pipeline_mode<synchronous>, transform_indices = @transform_3, window_bounds = array<i64: 1, 32>}, {pipeline_mode = #tpu.pipeline_mode<synchronous>, transform_indices = @transform_4, window_bounds = array<i64: 1, 32>}, {pipeline_mode = #tpu.pipeline_mode<synchronous>, transform_indices = @transform_5, window_bounds = array<i64: 1, 32>}, {pipeline_mode = #tpu.pipeline_mode<synchronous>, transform_indices = @transform_6, window_bounds = array<i64: 1, 32>}, {pipeline_mode = #tpu.pipeline_mode<synchronous>, transform_indices = @transform_7, window_bounds = array<i64: 1, 32>}, {pipeline_mode = #tpu.pipeline_mode<synchronous>, transform_indices = @transform_8, window_bounds = array<i64: 32, 128>}, {pipeline_mode = #tpu.pipeline_mode<synchronous>, transform_indices = @transform_9, window_bounds = array<i64: 1, 128>}, {pipeline_mode = #tpu.pipeline_mode<synchronous>, transform_indices = @transform_10, window_bounds = array<i64: 128, 32>}, {pipeline_mode = #tpu.pipeline_mode<synchronous>, transform_indices = @transform_11, window_bounds = array<i64: 1, 32>}, {transform_indices = @transform_12, window_bounds = array<i64: 8, 32>}]} {
    %c0 = arith.constant 0 : index
    %c0_0 = arith.constant 0 : index
    %0 = vector.load %arg1[%c0, %c0_0] : memref<8x32xf32, #tpu.memory_space<vmem>>, vector<8x32xf32>
    %c0_1 = arith.constant 0 : index
    %c0_2 = arith.constant 0 : index
    %1 = vector.load %arg5[%c0_1, %c0_2] : memref<1x32xf32, #tpu.memory_space<vmem>>, vector<1x32xf32>
    %c0_3 = arith.constant 0 : index
    %c0_4 = arith.constant 0 : index
    %2 = vector.load %arg6[%c0_3, %c0_4] : memref<1x32xf32, #tpu.memory_space<vmem>>, vector<1x32xf32>
    %cst = arith.constant dense<0.000000e+00> : vector<8xf32>
    %3 = vector.multi_reduction <add>, %0, %cst [1] : vector<8x32xf32> to vector<8xf32>
    %4 = vector.shape_cast %3 : vector<8xf32> to vector<8x1xf32>
    %cst_5 = arith.constant 3.200000e+01 : f32
    %5 = vector.broadcast %cst_5 : f32 to vector<8x1xf32>
    %6 = arith.divf %4, %5 : vector<8x1xf32>
    %7 = vector.broadcast %6 : vector<8x1xf32> to vector<8x32xf32>
    %8 = arith.subf %0, %7 : vector<8x32xf32>
    %9 = arith.mulf %8, %8 : vector<8x32xf32>
    %cst_6 = arith.constant dense<0.000000e+00> : vector<8xf32>
    %10 = vector.multi_reduction <add>, %9, %cst_6 [1] : vector<8x32xf32> to vector<8xf32>
    %11 = vector.shape_cast %10 : vector<8xf32> to vector<8x1xf32>
    %cst_7 = arith.constant 3.200000e+01 : f32
    %12 = vector.broadcast %cst_7 : f32 to vector<8x1xf32>
    %13 = arith.divf %11, %12 : vector<8x1xf32>
    %14 = vector.broadcast %6 : vector<8x1xf32> to vector<8x32xf32>
    %15 = arith.subf %0, %14 : vector<8x32xf32>
    %cst_8 = arith.constant 9.99999974E-6 : f32
    %16 = vector.broadcast %cst_8 : f32 to vector<8x1xf32>
    %17 = arith.addf %13, %16 : vector<8x1xf32>
    %18 = math.rsqrt %17 : vector<8x1xf32>
    %19 = vector.broadcast %18 : vector<8x1xf32> to vector<8x32xf32>
    %20 = arith.mulf %15, %19 : vector<8x32xf32>
    %21 = vector.broadcast %1 : vector<1x32xf32> to vector<8x32xf32>
    %22 = arith.mulf %20, %21 : vector<8x32xf32>
    %23 = vector.broadcast %2 : vector<1x32xf32> to vector<8x32xf32>
    %24 = arith.addf %22, %23 : vector<8x32xf32>
    %c0_9 = arith.constant 0 : index
    %c0_10 = arith.constant 0 : index
    %25 = vector.load %arg2[%c0_9, %c0_10] : memref<32x96xf32, #tpu.memory_space<vmem>>, vector<32x96xf32>
    %cst_11 = arith.constant dense<0.000000e+00> : vector<8x96xf32>
    %26 = tpu.matmul %24, %25, %cst_11 {dimension_numbers = #tpu.dot_dimension_numbers<[1], [0], [0], [1], [0, 0, 1, 1], [], []>} : vector<8x32xf32>, vector<32x96xf32>, vector<8x96xf32> -> vector<8x96xf32>
    %27 = vector.extract_strided_slice %26 {offsets = [0, 0], sizes = [8, 32], strides = [1, 1]} : vector<8x96xf32> to vector<8x32xf32>
    %28 = vector.extract_strided_slice %26 {offsets = [0, 32], sizes = [8, 32], strides = [1, 1]} : vector<8x96xf32> to vector<8x32xf32>
    %29 = vector.extract_strided_slice %26 {offsets = [0, 64], sizes = [8, 32], strides = [1, 1]} : vector<8x96xf32> to vector<8x32xf32>
    %30 = tpu.iota {dimensions = array<i32: 0>} : vector<8x8xi32>
    %31 = tpu.iota {dimensions = array<i32: 1>} : vector<8x8xi32>
    %32 = arith.cmpi sle, %31, %30 : vector<8x8xi32>
    %33 = vector.extract_strided_slice %27 {offsets = [0, 0], sizes = [8, 16], strides = [1, 1]} : vector<8x32xf32> to vector<8x16xf32>
    %34 = vector.extract_strided_slice %28 {offsets = [0, 0], sizes = [8, 16], strides = [1, 1]} : vector<8x32xf32> to vector<8x16xf32>
    %35 = vector.extract_strided_slice %29 {offsets = [0, 0], sizes = [8, 16], strides = [1, 1]} : vector<8x32xf32> to vector<8x16xf32>
    %cst_12 = arith.constant dense<0.000000e+00> : vector<8x8xf32>
    %36 = tpu.matmul %33, %34, %cst_12 {dimension_numbers = #tpu.dot_dimension_numbers<[1], [1], [0], [0], [0, 0, 1, 0], [], []>} : vector<8x16xf32>, vector<8x16xf32>, vector<8x8xf32> -> vector<8x8xf32>
    %cst_13 = arith.constant -1.000000e+30 : f32
    %37 = vector.broadcast %cst_13 : f32 to vector<8x8xf32>
    %38 = arith.select %32, %36, %37 : vector<8x8xi1>, vector<8x8xf32>
    %cst_14 = arith.constant dense<0xFF800000> : vector<8xf32>
    %39 = vector.multi_reduction <maximumf>, %38, %cst_14 [1] : vector<8x8xf32> to vector<8xf32>
    %40 = vector.shape_cast %39 : vector<8xf32> to vector<8x1xf32>
    %41 = vector.broadcast %40 : vector<8x1xf32> to vector<8x8xf32>
    %42 = arith.subf %38, %41 : vector<8x8xf32>
    %43 = math.exp %42 : vector<8x8xf32>
    %cst_15 = arith.constant dense<0.000000e+00> : vector<8xf32>
    %44 = vector.multi_reduction <add>, %43, %cst_15 [1] : vector<8x8xf32> to vector<8xf32>
    %45 = vector.shape_cast %44 : vector<8xf32> to vector<8x1xf32>
    %46 = tpu.reciprocal %45 {approx = true} : vector<8x1xf32> -> vector<8x1xf32>
    %cst_16 = arith.constant dense<0.000000e+00> : vector<8x16xf32>
    %47 = tpu.matmul %43, %35, %cst_16 {dimension_numbers = #tpu.dot_dimension_numbers<[1], [0], [0], [1], [0, 0, 1, 1], [], []>} : vector<8x8xf32>, vector<8x16xf32>, vector<8x16xf32> -> vector<8x16xf32>
    %48 = vector.broadcast %46 : vector<8x1xf32> to vector<8x16xf32>
    %49 = arith.mulf %47, %48 : vector<8x16xf32>
    %c0_17 = arith.constant 0 : index
    %c0_18 = arith.constant 0 : index
    %50 = vector.load %arg14[%c0_17, %c0_18] : memref<8x32xf32, #tpu.memory_space<vmem>>, vector<8x16xf32>
    tpu.vector_store %arg14[%c0_17, %c0_18], %49 {strides = array<i32>} : memref<8x32xf32, #tpu.memory_space<vmem>>, vector<8x16xf32>,
    %51 = vector.extract_strided_slice %27 {offsets = [0, 16], sizes = [8, 16], strides = [1, 1]} : vector<8x32xf32> to vector<8x16xf32>
    %52 = vector.extract_strided_slice %28 {offsets = [0, 16], sizes = [8, 16], strides = [1, 1]} : vector<8x32xf32> to vector<8x16xf32>
    %53 = vector.extract_strided_slice %29 {offsets = [0, 16], sizes = [8, 16], strides = [1, 1]} : vector<8x32xf32> to vector<8x16xf32>
    %cst_19 = arith.constant dense<0.000000e+00> : vector<8x8xf32>
    %54 = tpu.matmul %51, %52, %cst_19 {dimension_numbers = #tpu.dot_dimension_numbers<[1], [1], [0], [0], [0, 0, 1, 0], [], []>} : vector<8x16xf32>, vector<8x16xf32>, vector<8x8xf32> -> vector<8x8xf32>
    %cst_20 = arith.constant -1.000000e+30 : f32
    %55 = vector.broadcast %cst_20 : f32 to vector<8x8xf32>
    %56 = arith.select %32, %54, %55 : vector<8x8xi1>, vector<8x8xf32>
    %cst_21 = arith.constant dense<0xFF800000> : vector<8xf32>
    %57 = vector.multi_reduction <maximumf>, %56, %cst_21 [1] : vector<8x8xf32> to vector<8xf32>
    %58 = vector.shape_cast %57 : vector<8xf32> to vector<8x1xf32>
    %59 = vector.broadcast %58 : vector<8x1xf32> to vector<8x8xf32>
    %60 = arith.subf %56, %59 : vector<8x8xf32>
    %61 = math.exp %60 : vector<8x8xf32>
    %cst_22 = arith.constant dense<0.000000e+00> : vector<8xf32>
    %62 = vector.multi_reduction <add>, %61, %cst_22 [1] : vector<8x8xf32> to vector<8xf32>
    %63 = vector.shape_cast %62 : vector<8xf32> to vector<8x1xf32>
    %64 = tpu.reciprocal %63 {approx = true} : vector<8x1xf32> -> vector<8x1xf32>
    %cst_23 = arith.constant dense<0.000000e+00> : vector<8x16xf32>
    %65 = tpu.matmul %61, %53, %cst_23 {dimension_numbers = #tpu.dot_dimension_numbers<[1], [0], [0], [1], [0, 0, 1, 1], [], []>} : vector<8x8xf32>, vector<8x16xf32>, vector<8x16xf32> -> vector<8x16xf32>
    %66 = vector.broadcast %64 : vector<8x1xf32> to vector<8x16xf32>
    %67 = arith.mulf %65, %66 : vector<8x16xf32>
    %c0_24 = arith.constant 0 : index
    %c16 = arith.constant 16 : index
    %68 = vector.load %arg14[%c0_24, %c16] : memref<8x32xf32, #tpu.memory_space<vmem>>, vector<8x16xf32>
    tpu.vector_store %arg14[%c0_24, %c16], %67 {strides = array<i32>} : memref<8x32xf32, #tpu.memory_space<vmem>>, vector<8x16xf32>,
    %c0_25 = arith.constant 0 : index
    %c0_26 = arith.constant 0 : index
    %69 = vector.load %arg14[%c0_25, %c0_26] : memref<8x32xf32, #tpu.memory_space<vmem>>, vector<8x32xf32>
    %c0_27 = arith.constant 0 : index
    %c0_28 = arith.constant 0 : index
    %70 = vector.load %arg3[%c0_27, %c0_28] : memref<32x32xf32, #tpu.memory_space<vmem>>, vector<32x32xf32>
    %cst_29 = arith.constant dense<0.000000e+00> : vector<8x32xf32>
    %71 = tpu.matmul %69, %70, %cst_29 {dimension_numbers = #tpu.dot_dimension_numbers<[1], [0], [0], [1], [0, 0, 1, 1], [], []>} : vector<8x32xf32>, vector<32x32xf32>, vector<8x32xf32> -> vector<8x32xf32>
    %c0_30 = arith.constant 0 : index
    %c0_31 = arith.constant 0 : index
    %72 = vector.load %arg4[%c0_30, %c0_31] : memref<1x32xf32, #tpu.memory_space<vmem>>, vector<1x32xf32>
    %73 = vector.broadcast %72 : vector<1x32xf32> to vector<8x32xf32>
    %74 = arith.addf %71, %73 : vector<8x32xf32>
    %75 = arith.addf %0, %74 : vector<8x32xf32>
    %c0_32 = arith.constant 0 : index
    %c0_33 = arith.constant 0 : index
    %76 = vector.load %arg7[%c0_32, %c0_33] : memref<1x32xf32, #tpu.memory_space<vmem>>, vector<1x32xf32>
    %c0_34 = arith.constant 0 : index
    %c0_35 = arith.constant 0 : index
    %77 = vector.load %arg8[%c0_34, %c0_35] : memref<1x32xf32, #tpu.memory_space<vmem>>, vector<1x32xf32>
    %cst_36 = arith.constant dense<0.000000e+00> : vector<8xf32>
    %78 = vector.multi_reduction <add>, %75, %cst_36 [1] : vector<8x32xf32> to vector<8xf32>
    %79 = vector.shape_cast %78 : vector<8xf32> to vector<8x1xf32>
    %cst_37 = arith.constant 3.200000e+01 : f32
    %80 = vector.broadcast %cst_37 : f32 to vector<8x1xf32>
    %81 = arith.divf %79, %80 : vector<8x1xf32>
    %82 = vector.broadcast %81 : vector<8x1xf32> to vector<8x32xf32>
    %83 = arith.subf %75, %82 : vector<8x32xf32>
    %84 = arith.mulf %83, %83 : vector<8x32xf32>
    %cst_38 = arith.constant dense<0.000000e+00> : vector<8xf32>
    %85 = vector.multi_reduction <add>, %84, %cst_38 [1] : vector<8x32xf32> to vector<8xf32>
    %86 = vector.shape_cast %85 : vector<8xf32> to vector<8x1xf32>
    %cst_39 = arith.constant 3.200000e+01 : f32
    %87 = vector.broadcast %cst_39 : f32 to vector<8x1xf32>
    %88 = arith.divf %86, %87 : vector<8x1xf32>
    %89 = vector.broadcast %81 : vector<8x1xf32> to vector<8x32xf32>
    %90 = arith.subf %75, %89 : vector<8x32xf32>
    %cst_40 = arith.constant 9.99999974E-6 : f32
    %91 = vector.broadcast %cst_40 : f32 to vector<8x1xf32>
    %92 = arith.addf %88, %91 : vector<8x1xf32>
    %93 = math.rsqrt %92 : vector<8x1xf32>
    %94 = vector.broadcast %93 : vector<8x1xf32> to vector<8x32xf32>
    %95 = arith.mulf %90, %94 : vector<8x32xf32>
    %96 = vector.broadcast %76 : vector<1x32xf32> to vector<8x32xf32>
    %97 = arith.mulf %95, %96 : vector<8x32xf32>
    %98 = vector.broadcast %77 : vector<1x32xf32> to vector<8x32xf32>
    %99 = arith.addf %97, %98 : vector<8x32xf32>
    %c0_41 = arith.constant 0 : index
    %c0_42 = arith.constant 0 : index
    %100 = vector.load %arg9[%c0_41, %c0_42] : memref<32x128xf32, #tpu.memory_space<vmem>>, vector<32x128xf32>
    %cst_43 = arith.constant dense<0.000000e+00> : vector<8x128xf32>
    %101 = tpu.matmul %99, %100, %cst_43 {dimension_numbers = #tpu.dot_dimension_numbers<[1], [0], [0], [1], [0, 0, 1, 1], [], []>} : vector<8x32xf32>, vector<32x128xf32>, vector<8x128xf32> -> vector<8x128xf32>
    %c0_44 = arith.constant 0 : index
    %c0_45 = arith.constant 0 : index
    %102 = vector.load %arg10[%c0_44, %c0_45] : memref<1x128xf32, #tpu.memory_space<vmem>>, vector<1x128xf32>
    %103 = vector.broadcast %102 : vector<1x128xf32> to vector<8x128xf32>
    %104 = arith.addf %101, %103 : vector<8x128xf32>
    %cst_46 = arith.constant 0.000000e+00 : f32
    %105 = vector.broadcast %cst_46 : f32 to vector<8x128xf32>
    %106 = arith.maximumf %104, %105 : vector<8x128xf32>
    %c0_47 = arith.constant 0 : index
    %c0_48 = arith.constant 0 : index
    %107 = vector.load %arg11[%c0_47, %c0_48] : memref<128x32xf32, #tpu.memory_space<vmem>>, vector<128x32xf32>
    %cst_49 = arith.constant dense<0.000000e+00> : vector<8x32xf32>
    %108 = tpu.matmul %106, %107, %cst_49 {dimension_numbers = #tpu.dot_dimension_numbers<[1], [0], [0], [1], [0, 0, 1, 1], [], []>} : vector<8x128xf32>, vector<128x32xf32>, vector<8x32xf32> -> vector<8x32xf32>
    %c0_50 = arith.constant 0 : index
    %c0_51 = arith.constant 0 : index
    %109 = vector.load %arg12[%c0_50, %c0_51] : memref<1x32xf32, #tpu.memory_space<vmem>>, vector<1x32xf32>
    %110 = vector.broadcast %109 : vector<1x32xf32> to vector<8x32xf32>
    %111 = arith.addf %108, %110 : vector<8x32xf32>
    %112 = arith.addf %75, %111 : vector<8x32xf32>
    %c0_52 = arith.constant 0 : index
    %c0_53 = arith.constant 0 : index
    %113 = vector.load %arg13[%c0_52, %c0_53] : memref<8x32xf32, #tpu.memory_space<vmem>>, vector<8x32xf32>
    tpu.vector_store %arg13[%c0_52, %c0_53], %112 {strides = array<i32>} : memref<8x32xf32, #tpu.memory_space<vmem>>, vector<8x32xf32>,
    return
  }
  func.func @transform_0(%arg0: i32) -> (i32, i32) {
    %c0_i32 = arith.constant 0 : i32
    %c0_i32_0 = arith.constant 0 : i32
    return %arg0, %c0_i32 : i32, i32
  }
  func.func @transform_1(%arg0: i32) -> (i32, i32) {
    %c0_i32 = arith.constant 0 : i32
    %c0_i32_0 = arith.constant 0 : i32
    %c0_i32_1 = arith.constant 0 : i32
    return %c0_i32, %c0_i32_0 : i32, i32
  }
  func.func @transform_2(%arg0: i32) -> (i32, i32) {
    %c0_i32 = arith.constant 0 : i32
    %c0_i32_0 = arith.constant 0 : i32
    %c0_i32_1 = arith.constant 0 : i32
    return %c0_i32, %c0_i32_0 : i32, i32
  }
  func.func @transform_3(%arg0: i32) -> (i32, i32) {
    %c0_i32 = arith.constant 0 : i32
    %c0_i32_0 = arith.constant 0 : i32
    %c0_i32_1 = arith.constant 0 : i32
    return %c0_i32, %c0_i32_0 : i32, i32
  }
  func.func @transform_4(%arg0: i32) -> (i32, i32) {
    %c0_i32 = arith.constant 0 : i32
    %c0_i32_0 = arith.constant 0 : i32
    %c0_i32_1 = arith.constant 0 : i32
    return %c0_i32, %c0_i32_0 : i32, i32
  }
  func.func @transform_5(%arg0: i32) -> (i32, i32) {
    %c0_i32 = arith.constant 0 : i32
    %c0_i32_0 = arith.constant 0 : i32
    %c0_i32_1 = arith.constant 0 : i32
    return %c0_i32, %c0_i32_0 : i32, i32
  }
  func.func @transform_6(%arg0: i32) -> (i32, i32) {
    %c0_i32 = arith.constant 0 : i32
    %c0_i32_0 = arith.constant 0 : i32
    %c0_i32_1 = arith.constant 0 : i32
    return %c0_i32, %c0_i32_0 : i32, i32
  }
  func.func @transform_7(%arg0: i32) -> (i32, i32) {
    %c0_i32 = arith.constant 0 : i32
    %c0_i32_0 = arith.constant 0 : i32
    %c0_i32_1 = arith.constant 0 : i32
    return %c0_i32, %c0_i32_0 : i32, i32
  }
  func.func @transform_8(%arg0: i32) -> (i32, i32) {
    %c0_i32 = arith.constant 0 : i32
    %c0_i32_0 = arith.constant 0 : i32
    %c0_i32_1 = arith.constant 0 : i32
    return %c0_i32, %c0_i32_0 : i32, i32
  }
  func.func @transform_9(%arg0: i32) -> (i32, i32) {
    %c0_i32 = arith.constant 0 : i32
    %c0_i32_0 = arith.constant 0 : i32
    %c0_i32_1 = arith.constant 0 : i32
    return %c0_i32, %c0_i32_0 : i32, i32
  }
  func.func @transform_10(%arg0: i32) -> (i32, i32) {
    %c0_i32 = arith.constant 0 : i32
    %c0_i32_0 = arith.constant 0 : i32
    %c0_i32_1 = arith.constant 0 : i32
    return %c0_i32, %c0_i32_0 : i32, i32
  }
  func.func @transform_11(%arg0: i32) -> (i32, i32) {
    %c0_i32 = arith.constant 0 : i32
    %c0_i32_0 = arith.constant 0 : i32
    %c0_i32_1 = arith.constant 0 : i32
    return %c0_i32, %c0_i32_0 : i32, i32
  }
  func.func @transform_12(%arg0: i32) -> (i32, i32) {
    %c0_i32 = arith.constant 0 : i32
    %c0_i32_0 = arith.constant 0 : i32
    return %arg0, %c0_i32 : i32, i32
  }
}

</mosaic_0001>

<bundles_post_ra>
// kernel: tpu_custom_call.1
= control target key start
LH: loop header
LB: loop body
LE: loop exit
PB: predicated region body
PF: predicated region fallthrough
CT: control target
= control target key end

     0   :  { %s1283_s0 = inlined_call_operand.vmem [shape: f32[16,32], index: 0, kind: input, shape index: {}]   ;;  %s1284_s1 = inlined_call_operand.vmem [shape: f32[32,96], index: 1, kind: input, shape index: {}]   ;;  %s1285_s2 = inlined_call_operand.vmem [shape: f32[32,32], index: 2, kind: input, shape index: {}]   ;;  %s1286_s3 = inlined_call_operand.vmem [shape: f32[1,32], index: 3, kind: input, shape index: {}]   ;;  %s1287_s4 = inlined_call_operand.vmem [shape: f32[1,32], index: 4, kind: input, shape index: {}]   ;;  %s1288_s5 = inlined_call_operand.vmem [shape: f32[1,32], index: 5, kind: input, shape index: {}]   ;;  %s1289_s6 = inlined_call_operand.vmem [shape: f32[1,32], index: 6, kind: input, shape index: {}]   ;;  %s1290_s7 = inlined_call_operand.vmem [shape: f32[1,32], index: 7, kind: input, shape index: {}]   ;;  %s1291_s8 = inlined_call_operand.vmem [shape: f32[32,128], index: 8, kind: input, shape index: {}]   ;;  %s1292_s9 = inlined_call_operand.vmem [shape: f32[1,128], index: 9, kind: input, shape index: {}]   ;;  %s1293_s10 = inlined_call_operand.vmem [shape: f32[128,32], index: 10, kind: input, shape index: {}]   ;;  %s1294_s11 = inlined_call_operand.vmem [shape: f32[1,32], index: 11, kind: input, shape index: {}]   ;;  %s1295_s12 = inlined_call_operand.hbm [shape: f32[16,32], index: 12, kind: output, shape index: {}]  }
   0x1   :  { %1296 = sst [smem:[#allocation6_spill]] %s1283_s0 }
   0x2   :  { %1297 = sst [smem:[#allocation7_spill]] %s1284_s1 }
   0x3   :  { %1298 = sst [smem:[#allocation8_spill]] %s1285_s2 }
   0x4   :  { %17 = vsyncpa [#allocation4], 0 }
   0x5   :  { %19 = vsyncpa [#allocation4 + $0x1], 0  ;;  %s1058_s21 = smov 0   ;;  %s1060_s22 = smov 0  }
   0x6   :  { %s1062_s23 = smov 0   ;;  %s1064_s24 = smov 0  }
   0x7 LB: > { %s1079_s25 = sadd.s32 4294967295, %s984_s24   ;;  %s836_s26 = sadd.s32 4294967294, %s984_s24   ;;  %s984_s24 = sphi %s1064_s24, %s1307_s24   ;;  %s980_s23 = sphi %s1062_s23, %s1306_s23   ;;  %s976_s22 = sphi %s1060_s22, %s1305_s22   ;;  %s972_s21 = sphi %s1058_s21, %s1304_s21  }
   0x8   : > { %s1083_s27 = sadd.s32 1, %s984_s24   ;;  %s289_s28 = sadd.s32 1, %s980_s23 }
   0x9   : > { %s286_s29 = ssub.s32 %s984_s24, %s1083_s27  ;;  %p299_p0 = scmp.ne.s32.totalorder %s980_s23, %s976_s22 }
   0xa   : > { %p287_p1 = scmp.eq.s32.totalorder %s286_s29, 0  ;;  %p300_p2 = scmp.eq.s32.totalorder %s1079_s25, 1 }
   0xb   : > { %p305_p3 = scmp.ne.s32.totalorder %s976_s22, %s972_s21  ;;  %p306_p4 = scmp.eq.s32.totalorder %s836_s26, 1 }
   0xc   : > { %s1094_s30 = scalar_select %p287_p1, %s980_s23, %s289_s28  }
   0xd   : > { %p1096_p5 = por %p300_p2, %p299_p0  ;;  %p1100_p6 = por %p306_p4, %p305_p3 }
   0xe   : > { %p839_p7 = scmp.ge.s32.totalorder %s984_s24, 1  ;;  %p364_p8 = scmp.lt.s32.totalorder %s984_s24, 3 }
  0x10   : > { %p365_p9 = pnand %p839_p7, %p364_p8 }
  0x11   : > { %p405_p10 = scmp.lt.s32.totalorder (!%p365_p9), %s1079_s25, 1  ;;  %s1301_s0 = sld [smem:[#allocation6_spill]] (!%p365_p9) }
  0x12   : > { %368 = sbr.rel (%p365_p9) target bundleno = 1724 (0x6bc), region = 68  ;;  %s1302_s1 = sld [smem:[#allocation7_spill]] (!%p365_p9) }
  0x13   : > { %s987_s29 = smov (!%p365_p9), 112   ;;  %s990_s17 = smov (!%p365_p9), 64  }
  0x14   : > { %s991_s18 = smov (!%p365_p9), 48   ;;  %s1303_s2 = sld [smem:[#allocation8_spill]] (!%p365_p9) }
  0x17   : > { %s406_s15 = scalar_select %p405_p10, %s1079_s25, 1  ;;  %vm412_vm0 = vcmask 261120   ;;  %v986_v2 = vmov 32.0   ;;  %v901_v27 = vld [vmem:[%s1287_s4] ss:$0 sm:$0xff]  ;;  %vm485_vm5 = vcmask 130048   ;;  %v477_v38 = vlaneseq }
  0x18   : > { %908 = vrcp.f32 %v986_v2  ;;  %v453_v14 = vld [vmem:[%s1302_s1 + $0x18] sm:$0xff]  ;;  %v452_v15 = vld [vmem:[%s1302_s1 + $0x10] sm:$0xff]  ;;  %v451_v16 = vld [vmem:[%s1302_s1 + $0x8] sm:$0xff]  ;;  %vm511_vm7 = vcmask 64512   ;;  %vm620_vm8 = vcmask 261248  }
  0x19   : > { %s841_s16 = sshll.u32 %s406_s15, 3  ;;  %469 = vmatpush.msra.mxu2 %v453_v14  ;;  %v450_v17 = vld [vmem:[%s1302_s1] sm:$0xff]  ;;  %s988_s15 = smov 96   ;;  %v478_v39 = vshrl.u32 %v477_v38, 7  ;;  %v480_v40 = vand.u32 127, %v477_v38  ;;  %v724_v38 = vld [vmem:[%s1293_s10 + $0x28] sm:$0xff] }
  0x1a   : > { %s408_s19 = scalar_lea.vmem %s1301_s0, %s841_s16  ;;  %v902_v30 = vld [vmem:[%s1288_s5] ss:$0 sm:$0xff]  ;;  %s989_s16 = smov 80  }
  0x1b   : > { %v1111_v0 = vld [vmem:[%s408_s19] sm:$0xff]  ;;  %470 = vmatpush.msra.mxu2 %v452_v15  ;;  %vm481_vm6 = vcmp.le.s32.totalorder %v480_v40, %v478_v39  ;;  %s992_s19 = smov 16   ;;  %s402_s0 = sand.u32 1, %s976_s22  }
  0x1c   : > { %v413_v1 = vsel %vm412_vm0, %v1111_v0, 0.0  ;;  %v723_v40 = vld [vmem:[%s1293_s10 + $0x20] sm:$0xff] }
  0x1d   : > { %414 = vadd.xlane.f32.xlu0 %v413_v1  ;;  %471 = vmatpush.msra.mxu2 %v451_v16 }
  0x1e   : > { %v909_v3 = vpop.eup %908 }
  0x1f   : > { %v417_v4 = vmul.f32 32.0, %v909_v3  ;;  %vm421_vm1 = vweird.f32 %v909_v3  ;;  %472 = vmatpush.msra.mxu2 %v450_v17 }
  0x21   : > { %v418_v5 = vsub.f32 1.0, %v417_v4  ;;  %v625_v4 = vld [vmem:[%s1303_s2 + $0x10] sm:$0xff] }
  0x23   : > { %v419_v6 = vmul.f32 %v909_v3, %v418_v5  ;;  %v624_v5 = vld [vmem:[%s1303_s2 + $0x8] sm:$0xff] }
  0x25   : > { %v420_v7 = vadd.f32 %v909_v3, %v419_v6  ;;  %v623_v6 = vld [vmem:[%s1303_s2] sm:$0xff] }
  0x27   : > { %v1115_v8 = vsel %vm421_vm1, %v909_v3, %v420_v7  ;;  %v626_v3 = vld [vmem:[%s1303_s2 + $0x18] sm:$0xff] }
  0x90   : > { %v415_v9 = vpop.xlane.xlu0 %414 }
  0x91   : > { %v423_v10 = vmul.f32 %v1115_v8, %v415_v9 }
  0x93   : > { %v424_v11 = vsub.f32 %v1111_v0, %v423_v10  ;;  %v903_v10 = vld [vmem:[%s1286_s3] ss:$0 sm:$0xff] }
  0x95   : > { %v425_v12 = vmul.f32 %v424_v11, %v424_v11 }
  0x97   : > { %v426_v13 = vsel %vm412_vm0, %v425_v12, 0.0 }
  0x98   : > { %427 = vadd.xlane.f32.xlu0 %v426_v13 }
 0x10b   : > { %v428_v18 = vpop.xlane.xlu0 %427 }
 0x10c   : > { %v429_v19 = vmul.f32 %v428_v18, %v1115_v8 }
 0x10e   : > { %v430_v20 = vadd.f32 1e-05, %v429_v19 }
 0x110   : > { %910 = vrsqrt.f32 %v430_v20  ;;  %vm437_vm3 = vweird.f32 %v430_v20 }
 0x116   : > { %v911_v21 = vpop.eup %910 }
 0x117   : > { %v432_v22 = vmul.f32 %v911_v21, %v430_v20  ;;  %vm438_vm2 = vweird.f32 %v911_v21  ;;  %v690_v20 = vld [vmem:[%s1291_s8 + $0x18] sm:$0xff] }
 0x118   : > { %vm439_vm4 = vmor %vm437_vm3, %vm438_vm2 }
 0x119   : > { %v433_v23 = vmul.f32 %v911_v21, %v432_v22  ;;  %v687_v22 = vld [vmem:[%s1291_s8] sm:$0xff] }
 0x11b   : > { %v434_v24 = vmul.f32 0.5, %v433_v23  ;;  %v734_v23 = vld [vmem:[%s1293_s10 + $0x78] sm:$0xff] }
 0x11c   : > { %739 = vmatpush.msra.mxu0 %v734_v23 }
 0x11d   : > { %v435_v25 = vsub.f32 1.5, %v434_v24  ;;  %v733_v24 = vld [vmem:[%s1293_s10 + $0x70] sm:$0xff] }
 0x11e   : > { %740 = vmatpush.msra.mxu0 %v733_v24 }
 0x11f   : > { %v436_v26 = vmul.f32 %v911_v21, %v435_v25  ;;  %v732_v25 = vld [vmem:[%s1293_s10 + $0x68] sm:$0xff] }
 0x120   : > { %741 = vmatpush.msra.mxu0 %v732_v25 }
 0x121   : > { %v440_v28 = vsel %vm439_vm4, %v911_v21, %v436_v26  ;;  %v688_v21 = vld [vmem:[%s1291_s8 + $0x8] sm:$0xff] }
 0x122   : > { %v441_v29 = vmul.f32 %v440_v28, %v424_v11  ;;  %v731_v28 = vld [vmem:[%s1293_s10 + $0x60] sm:$0xff] }
 0x123   : > { %742 = vmatpush.msra.mxu0 %v731_v28 }
 0x124   : > { %v445_v31 = vmul.f32 %v901_v27, %v441_v29 }
 0x126   : > { %v449_v32 = vadd.f32 %v902_v30, %v445_v31  ;;  %v730_v30 = vld [vmem:[%s1293_s10 + $0x58] sm:$0xff]  ;;  %v729_v31 = vld [vmem:[%s1293_s10 + $0x50] sm:$0xff] }
 0x127   : > { %743 = vmatpush.msra.mxu0 %v730_v30 }
 0x128   : > { %842 = vmatmul.msk.f32.vlgmr.msra.gmra.mxu2 %vm412_vm0, %v449_v32  ;;  %v727_v32 = vld [vmem:[%s1293_s10 + $0x40] sm:$0xff] }
 0x129   : > { %744 = vmatpush.msra.mxu0 %v729_v31 }
 0x1ab   : > { %v474_v33 = vpop.f32.mrf.mxu2 }
 0x1ac   : > { %550 = vrot.lane.b32.xlu2 %v474_v33, %s987_s29  ;;  %483 = vrot.lane.b32.xlu1 %v474_v33, %s988_s15 }
 0x1b4   : > { %552 = vrot.lane.b32.xlu1 %v474_v33, %s989_s16 }
 0x1bc   : > { %522 = vrot.lane.b32.xlu1 %v474_v33, %s990_s17 }
 0x206   : > { %v551_v36 = vpop.permute.xlu2 %550 }
 0x21e   : > { %v484_v34 = vpop.permute.xlu1 %483 }
 0x21f   : > { %843 = vmatpush.xpose.msk.msra.mxu1 %vm485_vm5, %v484_v34  ;;  %v726_v34 = vld [vmem:[%s1293_s10 + $0x38] sm:$0xff] }
 0x222   : > { %844 = vmatmul.msk.f32.vlgmr.msra.gmra.mxu1 %vm485_vm5, %v474_v33 }
 0x223   : > { %646 = vmatpush.msrb.mxu1 %v626_v3 }
 0x225   : > { %647 = vmatpush.msrb.mxu1 %v625_v4 }
 0x226   : > { %v553_v35 = vpop.permute.xlu1 %552 }
 0x227   : > { %846 = vmatpush.xpose.msk.msra.mxu3 %vm485_vm5, %v553_v35  ;;  %648 = vmatpush.msrb.mxu1 %v624_v5 }
 0x229   : > { %649 = vmatpush.msrb.mxu1 %v623_v6 }
 0x22a   : > { %847 = vmatmul.msk.f32.vlgmr.msra.gmra.mxu3 %vm485_vm5, %v551_v36  ;;  %v725_v36 = vld [vmem:[%s1293_s10 + $0x30] sm:$0xff] }
 0x22b   : > { %710 = vmatpush.msrb.mxu3 %v690_v20 }
 0x22e   : > { %v523_v37 = vpop.permute.xlu1 %522 }
 0x22f   : > { %543 = vmatpush.msrb.mxu2 %v523_v37 }
 0x29f   : > { %v507_v41 = vpop.f32.mrf.mxu1 }
 0x2a0   : > { %v510_v42 = vsel %vm481_vm6, %v507_v41, -1e+30 }
 0x2a1   : > { %v512_v43 = vsel %vm511_vm7, %v510_v42, -inf }
 0x2a2   : > { %513 = vmax.xlane.f32.xlu2 %v512_v43 }
 0x2ad   : > { %v575_v44 = vpop.f32.mrf.mxu3 }
 0x2ae   : > { %v578_v45 = vsel %vm481_vm6, %v575_v44, -1e+30  ;;  %v904_v44 = vld [vmem:[%s1289_s6] ss:$0 sm:$0xff] }
 0x2af   : > { %v579_v46 = vsel %vm511_vm7, %v578_v45, -inf }
 0x2b0   : > { %580 = vmax.xlane.f32.xlu0 %v579_v46 }
 0x2c4   : > { %589 = vrot.lane.b32.xlu0 %v474_v33, %s991_s18  ;;  %s840_s18 = sshll.u32 %s402_s0, 3 }
 0x2c5   : > { %s404_s15 = scalar_lea.vmem [#allocation3], %s840_s18  ;;  %s942_s18 = scalar_lea.hbm %s1295_s12, 16 }
 0x2c6   : > { %s774_s16 = sshll.u32 %s404_s15, 4  ;;  %s775_s16 = int_to_ptr.vmem [resolvable:$true] %s774_s16 }
 0x315   : > { %v514_v47 = vpop.xlane.xlu2 %513 }
 0x316   : > { %v515_v48 = vsub.f32 %v510_v42, %v514_v47  ;;  %v722_v42 = vld [vmem:[%s1293_s10 + $0x18] sm:$0xff]  ;;  %v905_v47 = vld [vmem:[%s1290_s7] ss:$0 sm:$0xff] }
 0x318   : > { %v516_v49 = vmul.f32 1.442695, %v515_v48 }
 0x31a   : > { %912 = vpow2.f32 %v516_v49 }
 0x320   : > { %v913_v50 = vpop.eup %912 }
 0x321   : > { %845 = vmatmul.msk.f32.vlgmr.msrb.gmra.mxu2 %vm511_vm7, %v913_v50  ;;  %v518_v51 = vsel %vm511_vm7, %v913_v50, 0.0  ;;  %v721_v50 = vld [vmem:[%s1293_s10 + $0x10] sm:$0xff] }
 0x322   : > { %519 = vadd.xlane.f32.xlu0 %v518_v51  ;;  %v720_v51 = vld [vmem:[%s1293_s10 + $0x8] sm:$0xff] }
 0x323   : > { %v581_v52 = vpop.xlane.xlu0 %580 }
 0x324   : > { %v582_v53 = vsub.f32 %v578_v45, %v581_v52  ;;  %v719_v52 = vld [vmem:[%s1293_s10] sm:$0xff] }
 0x326   : > { %v583_v54 = vmul.f32 1.442695, %v582_v53  ;;  %v906_v53 = vld [vmem:[%s1292_s9] ss:$0 sm:$0xff] }
 0x328   : > { %914 = vpow2.f32 %v583_v54 }
 0x32e   : > { %v915_v55 = vpop.eup %914 }
 0x32f   : > { %v585_v56 = vsel %vm511_vm7, %v915_v55, 0.0 }
 0x330   : > { %586 = vadd.xlane.f32.xlu1 %v585_v56 }
 0x336   : > { %v590_v57 = vpop.permute.xlu0 %589 }
 0x337   : > { %610 = vmatpush.msra.mxu2 %v590_v57  ;;  %v907_v57 = vld [vmem:[%s1294_s11] ss:$0 sm:$0xff] }
 0x338   : > { %848 = vmatmul.msk.f32.vlgmr.msra.gmra.mxu2 %vm511_vm7, %v915_v55 }
 0x395   : > { %v520_v58 = vpop.xlane.xlu0 %519 }
 0x396   : > { %916 = vrcp.f32 %v520_v58 }
 0x39c   : > { %v917_v59 = vpop.eup %916 }
 0x3a3   : > { %v587_v62 = vpop.xlane.xlu1 %586 }
 0x3a4   : > { %v545_v60 = vpop.f32.mrf.mxu2  ;;  %918 = vrcp.f32 %v587_v62 }
 0x3a5   : > { %v548_v61 = vmul.f32 %v917_v59, %v545_v60 }
 0x3a7   : > { %549 = vst.msk [vmem:[#allocation2] sm:$0xff] %vm485_vm5, %v548_v61 }
 0x3aa   : > { %v919_v63 = vpop.eup %918 }
 0x3bb   : > { %v612_v1 = vpop.f32.mrf.mxu2 }
 0x3bc   : > { %v615_v2 = vmul.f32 %v919_v63, %v612_v1 }
 0x3be   : > { %617 = vrot.lane.b32.xlu2 %v615_v2, %s992_s19  ;;  %s852_s19 = sshll.u32 %s1079_s25, 3  ;;  %s762_s25 = scalar_lea.sflag [#allocation4], %s402_s0 }
 0x3bf   : > { %s772_s29 = scalar_lea.hbm %s1295_s12, %s852_s19 }
 0x3c0   : > { %s776_s17 = sshll.u32 %s772_s29, 4  ;;  %s777_s17 = int_to_ptr.hbm [resolvable:$true] %s776_s17 }
 0x3c1   : > { %s936_s2 = sshra.s32 %s777_s17, 4  ;;  %s937_s2 = int_to_ptr.hbm [resolvable:$true] %s936_s2 }
 0x3c2   : > { %s938_s20 = scalar_lea.hbm %s937_s2, 8  ;;  %p943_p0 = scmp.lt.s32.totalorder %s937_s2, %s1295_s12 }
 0x3c3   : > { %p939_p11 = scmp.ne.s32.totalorder %s937_s2, %s938_s20  ;;  %p944_p1 = scmp.lt.s32.totalorder %s942_s18, %s938_s20 }
 0x3c5   : > { %p940_p12 = pnand %p939_p11, %p1096_p5  ;;  %p945_p2 = por %p944_p1, %p943_p0 }
 0x3c7   : > { %p941_p13 = pneg %p940_p12 }
 0x3c9   : > { %p946_p3 = pnand %p945_p2, %p941_p13 }
 0x418   : > { %v618_v7 = vpop.permute.xlu2 %617 }
 0x419   : > { %621 = vst.msk [vmem:[#allocation2] sm:$0xff] %vm620_vm8, %v618_v7 }
 0x420   : > { %v622_v9 = vld [vmem:[#allocation2] sm:$0xff] }
 0x421   : > { %849 = vmatmul.msk.f32.vlgmr.msrb.gmra.mxu1 %vm412_vm0, %v622_v9 }
 0x49e   : > { %v651_v11 = vpop.f32.mrf.mxu1 }
 0x49f   : > { %v652_v12 = vadd.f32 %v903_v10, %v651_v11 }
 0x4a1   : > { %v1168_v13 = vadd.f32 %v652_v12, %v1111_v0  ;;  %v689_v0 = vld [vmem:[%s1291_s8 + $0x10] sm:$0xff] }
 0x4a2   : > { %711 = vmatpush.msrb.mxu3 %v689_v0 }
 0x4a3   : > { %v657_v14 = vsel %vm412_vm0, %v1168_v13, 0.0 }
 0x4a4   : > { %658 = vadd.xlane.f32.xlu1 %v657_v14  ;;  %712 = vmatpush.msrb.mxu3 %v688_v21 }
 0x4a6   : > { %713 = vmatpush.msrb.mxu3 %v687_v22 }
 0x517   : > { %v659_v15 = vpop.xlane.xlu1 %658 }
 0x518   : > { %v660_v16 = vmul.f32 %v659_v15, %v1115_v8 }
 0x51a   : > { %v661_v17 = vsub.f32 %v1168_v13, %v660_v16 }
 0x51c   : > { %v662_v18 = vmul.f32 %v661_v17, %v661_v17 }
 0x51e   : > { %v663_v19 = vsel %vm412_vm0, %v662_v18, 0.0 }
 0x51f   : > { %664 = vadd.xlane.f32.xlu2 %v663_v19 }
 0x592   : > { %v665_v26 = vpop.xlane.xlu2 %664 }
 0x593   : > { %v666_v27 = vmul.f32 %v665_v26, %v1115_v8  ;;  %v728_v8 = vld [vmem:[%s1293_s10 + $0x48] sm:$0xff] }
 0x594   : > { %745 = vmatpush.msra.mxu0 %v728_v8 }
 0x595   : > { %v667_v29 = vadd.f32 1e-05, %v666_v27 }
 0x596   : > { %746 = vmatpush.msra.mxu0 %v727_v32 }
 0x597   : > { %920 = vrsqrt.f32 %v667_v29  ;;  %vm674_vm10 = vweird.f32 %v667_v29 }
 0x598   : > { %747 = vmatpush.msra.mxu0 %v726_v34 }
 0x59a   : > { %748 = vmatpush.msra.mxu0 %v725_v36 }
 0x59c   : > { %749 = vmatpush.msra.mxu0 %v724_v38 }
 0x59d   : > { %v921_v33 = vpop.eup %920 }
 0x59e   : > { %v669_v35 = vmul.f32 %v921_v33, %v667_v29  ;;  %vm675_vm9 = vweird.f32 %v921_v33  ;;  %750 = vmatpush.msra.mxu0 %v723_v40 }
 0x59f   : > { %vm676_vm11 = vmor %vm674_vm10, %vm675_vm9 }
 0x5a0   : > { %v670_v37 = vmul.f32 %v921_v33, %v669_v35  ;;  %751 = vmatpush.msra.mxu0 %v722_v42 }
 0x5a2   : > { %v671_v39 = vmul.f32 0.5, %v670_v37  ;;  %752 = vmatpush.msra.mxu0 %v721_v50 }
 0x5a4   : > { %v672_v41 = vsub.f32 1.5, %v671_v39  ;;  %753 = vmatpush.msra.mxu0 %v720_v51 }
 0x5a6   : > { %v673_v43 = vmul.f32 %v921_v33, %v672_v41  ;;  %754 = vmatpush.msra.mxu0 %v719_v52 }
 0x5a8   : > { %v677_v45 = vsel %vm676_vm11, %v921_v33, %v673_v43 }
 0x5a9   : > { %v678_v46 = vmul.f32 %v677_v45, %v661_v17 }
 0x5ab   : > { %v682_v48 = vmul.f32 %v904_v44, %v678_v46 }
 0x5ad   : > { %v686_v49 = vadd.f32 %v905_v47, %v682_v48 }
 0x5af   : > { %850 = vmatmul.msk.f32.vlgmr.msrb.gmra.mxu3 %vm412_vm0, %v686_v49 }
 0x632   : > { %v715_v54 = vpop.f32.mrf.mxu3 }
 0x633   : > { %v716_v55 = vadd.f32 %v906_v53, %v715_v54 }
 0x635   : > { %v718_v56 = vmax.f32 %v716_v55, 0.0 }
 0x637   : > { %755 = vmatmul.f32.vlgmr.msra.gmra.mxu0 %v718_v56 }
 0x6b4   : > { %v756_v58 = vpop.f32.mrf.mxu0 }
 0x6b5   : > { %v757_v59 = vadd.f32 %v907_v57, %v756_v58 }
 0x6b7   : > { %v759_v60 = vadd.f32 %v757_v59, %v1168_v13 }
 0x6b9   : > { %760 = vst.msk [vmem:[%s404_s15] sm:$0xff] %vm412_vm0, %v759_v60 }
 0x6ba   : > { %949 = shalt.err (!%p946_p3)
}
 0x6bb   : > { %855 = dma.vmem_to_hbm [thread:$0]  (%p1096_p5), %s775_s16, 128, %s777_s17, %s762_s25  }
 0x6bc PF: > { %p861_p4 = scmp.ge.s32.totalorder %s984_s24, 2  ;;  %s788_s0 = sand.u32 1, %s972_s21  }
 0x6bd   : > { %s789_s29 = scalar_lea.sflag [#allocation4], %s788_s0 }
 0x6be   : > { %p858_p7 = pnand %p861_p4, %p1100_p6 }
 0x6c0   : > { %p859_p8 = pneg %p858_p7 }
 0x6c2   : > { %967 = dma.done.wait (%p859_p8), %s789_s29, 128  }
 0x6c3   : > { %969 = vsyncadd (%p859_p8), %s789_s29, 4294967168  ;;  %p22_p9 = scmp.ge.s32.totalorder %s1083_s27, 4   ;;  %s1304_s21 = smov %s976_s22 }
 0x6c4   : > { %s1305_s22 = smov %s980_s23  ;;  %s1306_s23 = smov %s1094_s30 }
 0x6c5   : > { %s1307_s24 = smov %s1083_s27  ;;  %24 = sbr.rel (!%p22_p9) target bundleno = 7 (0x7), region = 103 }
 0x6ca   :  { %795 = vsyncpa [#allocation4], 1 }
 0x6cb   :  { %797 = vsyncpa [#allocation4 + $0x1], 1 }

</bundles_post_ra>
